<compile_context>
chip_gen: v7x
topology: tpu7x:2x2x1
jax: 0.10.0
libtpu: 0.0.40
codegen_flags: <defaults>
</compile_context>

<pallas_src>
import jax
import jax.numpy as jnp
from jax.experimental import pallas as pl
from jax.experimental.pallas import tpu as pltpu


def _causal_conv1d_kernel(x_ref, w_ref, o_ref, carry_ref):
    # x_ref    : (1, Cin, TT)    current (batch, time-tile) slab, NCL layout
    # w_ref    : (Cout, 2*Cin)   columns [:Cin] -> tap for x[t-1], [Cin:] -> tap for x[t]
    # o_ref    : (1, Cout, TT)
    # carry_ref: (Cin, 1)        x[b, :, tile_start - 1] carried across T tiles
    t = pl.program_id(1)

    @pl.when(t == 0)
    def _():  # new batch row: causal padding (x[:, -1] == 0)
        carry_ref[...] = jnp.zeros_like(carry_ref)

    x = x_ref[0]                      # (Cin, TT)
    cin, tt = x.shape
    cout = o_ref.shape[1]

    boundary = carry_ref[...]         # (Cin, 1), read before it is overwritten
    last_col = x[:, tt - 1:]          # (Cin, 1), carried to the next tile

    # Causal shift along the lane (time) axis on the XLU; the wrap-around column 0
    # is patched on the INPUT from the carried boundary (single VPU select), so the
    # matmul result can be stored with one full-tile, lane-dense store.
    x_roll = pltpu.roll(x, shift=1, axis=1)
    lane = jax.lax.broadcasted_iota(jnp.int32, x.shape, 1)
    x_prev = jnp.where(lane == 0, boundary, x_roll)   # (Cin, TT) == x[b, :, t-1]

    w = w_ref[...]                    # (Cout, 2*Cin)

    use_vpu = (2 * cin * cout <= 1024) and (2 * cin <= 32)
    if use_vpu:
        # Tiny channels: unrolled broadcast-MAC on the VPU; an (Cout, Cin) matmul
        # would use a sliver of the MXU and pay push/pop latency every tile.
        wf = w.astype(jnp.float32)
        xpf = x_prev.astype(jnp.float32)
        xcf = x.astype(jnp.float32)
        acc = jnp.zeros((cout, tt), jnp.float32)
        for k in range(cin):                                   # tap 0: x[t-1]
            acc = acc + wf[:, k:k + 1] * xpf[k:k + 1, :]
        for k in range(cin):                                   # tap 1: x[t]
            acc = acc + wf[:, cin + k:cin + k + 1] * xcf[k:k + 1, :]
    elif cin % 8 == 0:
        # Fused single MXU pass over K = 2*Cin (halves MXU pushes / FIFO pops).
        xx = jnp.concatenate([x_prev, x], axis=0)              # (2*Cin, TT)
        acc = jnp.dot(w, xx, preferred_element_type=jnp.float32)
    else:
        # Sublane-unaligned Cin: keep the two-dot form (avoid unaligned concat).
        acc = jnp.dot(w[:, :cin], x_prev, preferred_element_type=jnp.float32)
        acc = acc + jnp.dot(w[:, cin:], x, preferred_element_type=jnp.float32)

    o_ref[0] = acc.astype(o_ref.dtype)

    # Save this tile's last sample for the next T tile of the same batch row.
    carry_ref[...] = last_col


def _round_up(n, m):
    return ((n + m - 1) // m) * m


def _vmem_budget_bytes():
    """Scoped-VMEM budget per generation: half of physical VMEM, capped at 64 MiB
    (v5e/v6e: 128 MiB phys -> 64 MiB budget; v7x: 64 MiB phys -> 32 MiB budget)."""
    phys = 128 * 1024 * 1024
    try:
        info = pltpu.get_tpu_info()
        phys = int(getattr(info, "vmem_capacity_bytes", phys))
    except Exception:
        pass
    return min(phys // 2, 64 * 1024 * 1024)


def _pick_t_tile(T, Cin, Cout, itemsize, vmem_budget):
    """Largest lane tile (multiple of 128) whose double-buffered in+out blocks fit
    in ~60% of the VMEM budget; big tiles amortize the ~0.35us per-grid-step cost."""
    usable = int(vmem_budget * 0.6)            # headroom for weights / scratch / spills
    per_col = 2 * (Cin + Cout) * itemsize      # double-buffered in + out, bytes per lane
    tt = usable // max(per_col, 1)
    tt = max(128, min(tt, 8192))
    tt = (tt // 128) * 128
    return min(tt, _round_up(T, 128))


def causal_conv1d(x_ncl, weight, *, activation_dtype=None, t_tile=None):
    """x_ncl: (B, Cin, T); weight: (Cout, Cin, 2)  ->  (B, Cout, T). NCL in/out.

    activation_dtype: optionally cast x/weights (e.g. jnp.bfloat16) — accumulation
                      stays f32 on the MXU; halves HBM traffic in this mem-bound op.
    t_tile:           optional override of the auto-sized time tile (rounded to 128).
    """
    B, Cin, T = x_ncl.shape
    Cout, Cin_w, K = weight.shape
    assert Cin_w == Cin and K == 2, "weight must be (Cout, Cin, 2)"

    if activation_dtype is not None:
        x_ncl = x_ncl.astype(activation_dtype)
        weight = weight.astype(activation_dtype)
    dtype = x_ncl.dtype
    itemsize = jnp.dtype(dtype).itemsize

    vmem_budget = _vmem_budget_bytes()
    if t_tile is not None:
        TT = min(max(128, _round_up(t_tile, 128)), _round_up(T, 128))
    else:
        TT = _pick_t_tile(T, Cin, Cout, itemsize, vmem_budget)

    T_pad = _round_up(T, TT)
    n_t = T_pad // TT
    if T_pad != T:
        # Right-pad with zeros: padded columns never feed earlier outputs (causal),
        # and their outputs are sliced off below.
        x_ncl = jnp.pad(x_ncl, ((0, 0), (0, 0), (0, T_pad - T)))

    # (Cout, 2*Cin): columns [:Cin] multiply x[t-1], columns [Cin:] multiply x[t].
    w_cat = jnp.concatenate([weight[:, :, 0], weight[:, :, 1]], axis=1)

    cost = pl.CostEstimate(
        flops=2 * 2 * B * T_pad * Cin * Cout,
        transcendentals=0,
        bytes_accessed=itemsize * (B * Cin * T_pad + B * Cout * T_pad + 2 * Cout * Cin),
    )

    out = pl.pallas_call(
        _causal_conv1d_kernel,
        out_shape=jax.ShapeDtypeStruct((B, Cout, T_pad), dtype),
        grid_spec=pltpu.PrefetchScalarGridSpec(
            num_scalar_prefetch=0,
            # Carry invariant: T must stay the last ("arbitrary") grid axis so each
            # batch row's tiles run sequentially on one core (reset at t == 0).
            grid=(B, n_t),
            in_specs=[
                pl.BlockSpec((1, Cin, TT), lambda b, t: (b, 0, t)),
                pl.BlockSpec((Cout, 2 * Cin), lambda b, t: (0, 0)),
            ],
            out_specs=pl.BlockSpec((1, Cout, TT), lambda b, t: (b, 0, t)),
            scratch_shapes=[pltpu.VMEM((Cin, 1), dtype)],
        ),
        compiler_params=pltpu.CompilerParams(
            dimension_semantics=("parallel", "arbitrary"),
            vmem_limit_bytes=vmem_budget,
        ),
        cost_estimate=cost,
    )(x_ncl, w_cat)

    return out[:, :, :T] if T_pad != T else out


if __name__ == "__main__":
    key = jax.random.PRNGKey(0)
    kx, kw, kx2, kw2 = jax.random.split(key, 4)

    def reference(x, w):
        # Full Conv1d with padding=1, then drop the last time step (PyTorch semantics).
        return jax.lax.conv_general_dilated(
            x, w, window_strides=(1,), padding=[(1, 1)],
            dimension_numbers=("NCH", "OIH", "NCH"))[:, :, :-1]

    # Small shapes consistent with the module's forward (VPU fallback path, single tile).
    B, Cin, Cout, T = 2, 4, 8, 16
    x = jax.random.normal(kx, (B, Cin, T), dtype=jnp.float32)
    weight = jax.random.normal(kw, (Cout, Cin, 2), dtype=jnp.float32)
    out = jax.block_until_ready(causal_conv1d(x, weight))
    assert out.shape == (B, Cout, T)
    assert jnp.allclose(out, reference(x, weight), atol=1e-5, rtol=1e-5)

    # Larger channels, non-128-multiple T, forced small tile: exercises the fused
    # single-matmul MXU path, T padding, and the cross-tile causal carry.
    B2, Cin2, Cout2, T2 = 2, 64, 64, 1000
    x2 = jax.random.normal(kx2, (B2, Cin2, T2), dtype=jnp.float32)
    weight2 = jax.random.normal(kw2, (Cout2, Cin2, 2), dtype=jnp.float32)
    out2 = jax.block_until_ready(causal_conv1d(x2, weight2, t_tile=256))
    assert out2.shape == (B2, Cout2, T2)
    assert jnp.allclose(out2, reference(x2, weight2), atol=1e-4, rtol=1e-4)

    # Auto-sized (VMEM-budget) tile + bf16 activation path (smoke: compile + finite).
    out3 = jax.block_until_ready(causal_conv1d(x2, weight2))
    assert jnp.allclose(out3, reference(x2, weight2), atol=1e-4, rtol=1e-4)
    out_bf16 = jax.block_until_ready(
        causal_conv1d(x2, weight2, activation_dtype=jnp.bfloat16))
    assert out_bf16.shape == (B2, Cout2, T2)
    assert bool(jnp.all(jnp.isfinite(out_bf16.astype(jnp.float32))))

    print("KERNEL_OK")
</pallas_src>

<mosaic_0001>
module attributes {stable_mosaic.version = 11 : i64} {
  func.func @_causal_conv1d_kernel(%arg0: i32, %arg1: i32, %arg2: memref<1x4x128xf32, #tpu.memory_space<vmem>>, %arg3: memref<8x8xf32, #tpu.memory_space<vmem>>, %arg4: memref<1x8x128xf32, #tpu.memory_space<vmem>>, %arg5: memref<4x1xf32, #tpu.memory_space<vmem>>) attributes {dimension_semantics = [#tpu.dimension_semantics<parallel>, #tpu.dimension_semantics<arbitrary>], iteration_bounds = array<i64: 2, 1>, scalar_prefetch = 0 : i64, scratch_operands = 1 : i64, tpu.core_type = #tpu.core_type<tc>, window_params = [{transform_indices = @transform_0, window_bounds = array<i64: 1, 4, 128>}, {pipeline_mode = #tpu.pipeline_mode<synchronous>, transform_indices = @transform_1, window_bounds = array<i64: 8, 8>}, {transform_indices = @transform_2, window_bounds = array<i64: 1, 8, 128>}]} {
    %c0_i32 = arith.constant 0 : i32
    %0 = arith.cmpi eq, %arg1, %c0_i32 : i32
    %1 = arith.extui %0 : i1 to i32
    %c0_i32_0 = arith.constant 0 : i32
    %2 = arith.cmpi ne, %1, %c0_i32_0 : i32
    scf.if %2 {
      %cst_13 = arith.constant 0.000000e+00 : f32
      %68 = vector.broadcast %cst_13 : f32 to vector<4x1xf32>
      %c0_14 = arith.constant 0 : index
      %c0_15 = arith.constant 0 : index
      %69 = vector.load %arg5[%c0_14, %c0_15] : memref<4x1xf32, #tpu.memory_space<vmem>>, vector<4x1xf32>
      tpu.vector_store %arg5[%c0_14, %c0_15], %68 {strides = array<i32>} : memref<4x1xf32, #tpu.memory_space<vmem>>, vector<4x1xf32>,
    } else {
    }
    %c0 = arith.constant 0 : index
    %c0_1 = arith.constant 0 : index
    %c0_2 = arith.constant 0 : index
    %3 = vector.load %arg2[%c0, %c0_1, %c0_2] : memref<1x4x128xf32, #tpu.memory_space<vmem>>, vector<1x4x128xf32>
    %4 = vector.shape_cast %3 : vector<1x4x128xf32> to vector<4x128xf32>
    %c0_3 = arith.constant 0 : index
    %c0_4 = arith.constant 0 : index
    %5 = vector.load %arg5[%c0_3, %c0_4] : memref<4x1xf32, #tpu.memory_space<vmem>>, vector<4x1xf32>
    %6 = vector.extract_strided_slice %4 {offsets = [0, 127], sizes = [4, 1], strides = [1, 1]} : vector<4x128xf32> to vector<4x1xf32>
    %c1_i32 = arith.constant 1 : i32
    %7 = tpu.dynamic_rotate %4 by %c1_i32 dim 1 : vector<4x128xf32>, i32 -> vector<4x128xf32>
    %8 = tpu.iota {dimensions = array<i32: 1>} : vector<4x128xi32>
    %c0_i32_5 = arith.constant 0 : i32
    %9 = vector.broadcast %c0_i32_5 : i32 to vector<4x128xi32>
    %10 = arith.cmpi eq, %8, %9 : vector<4x128xi32>
    %11 = vector.shape_cast %5 : vector<4x1xf32> to vector<4x1xf32>
    %12 = vector.broadcast %11 : vector<4x1xf32> to vector<4x128xf32>
    %13 = arith.select %10, %12, %7 : vector<4x128xi1>, vector<4x128xf32>
    %c0_6 = arith.constant 0 : index
    %c0_7 = arith.constant 0 : index
    %14 = vector.load %arg3[%c0_6, %c0_7] : memref<8x8xf32, #tpu.memory_space<vmem>>, vector<8x8xf32>
    %cst = arith.constant 0.000000e+00 : f32
    %15 = vector.broadcast %cst : f32 to vector<8x128xf32>
    %16 = vector.extract_strided_slice %14 {offsets = [0, 0], sizes = [8, 1], strides = [1, 1]} : vector<8x8xf32> to vector<8x1xf32>
    %17 = vector.extract_strided_slice %13 {offsets = [0, 0], sizes = [1, 128], strides = [1, 1]} : vector<4x128xf32> to vector<1x128xf32>
    %18 = vector.broadcast %16 : vector<8x1xf32> to vector<8x128xf32>
    %19 = vector.broadcast %17 : vector<1x128xf32> to vector<8x128xf32>
    %20 = arith.mulf %18, %19 : vector<8x128xf32>
    %21 = arith.addf %15, %20 : vector<8x128xf32>
    %22 = vector.extract_strided_slice %14 {offsets = [0, 1], sizes = [8, 1], strides = [1, 1]} : vector<8x8xf32> to vector<8x1xf32>
    %23 = vector.extract_strided_slice %13 {offsets = [1, 0], sizes = [1, 128], strides = [1, 1]} : vector<4x128xf32> to vector<1x128xf32>
    %24 = vector.broadcast %22 : vector<8x1xf32> to vector<8x128xf32>
    %25 = vector.broadcast %23 : vector<1x128xf32> to vector<8x128xf32>
    %26 = arith.mulf %24, %25 : vector<8x128xf32>
    %27 = arith.addf %21, %26 : vector<8x128xf32>
    %28 = vector.extract_strided_slice %14 {offsets = [0, 2], sizes = [8, 1], strides = [1, 1]} : vector<8x8xf32> to vector<8x1xf32>
    %29 = vector.extract_strided_slice %13 {offsets = [2, 0], sizes = [1, 128], strides = [1, 1]} : vector<4x128xf32> to vector<1x128xf32>
    %30 = vector.broadcast %28 : vector<8x1xf32> to vector<8x128xf32>
    %31 = vector.broadcast %29 : vector<1x128xf32> to vector<8x128xf32>
    %32 = arith.mulf %30, %31 : vector<8x128xf32>
    %33 = arith.addf %27, %32 : vector<8x128xf32>
    %34 = vector.extract_strided_slice %14 {offsets = [0, 3], sizes = [8, 1], strides = [1, 1]} : vector<8x8xf32> to vector<8x1xf32>
    %35 = vector.extract_strided_slice %13 {offsets = [3, 0], sizes = [1, 128], strides = [1, 1]} : vector<4x128xf32> to vector<1x128xf32>
    %36 = vector.broadcast %34 : vector<8x1xf32> to vector<8x128xf32>
    %37 = vector.broadcast %35 : vector<1x128xf32> to vector<8x128xf32>
    %38 = arith.mulf %36, %37 : vector<8x128xf32>
    %39 = arith.addf %33, %38 : vector<8x128xf32>
    %40 = vector.extract_strided_slice %14 {offsets = [0, 4], sizes = [8, 1], strides = [1, 1]} : vector<8x8xf32> to vector<8x1xf32>
    %41 = vector.extract_strided_slice %4 {offsets = [0, 0], sizes = [1, 128], strides = [1, 1]} : vector<4x128xf32> to vector<1x128xf32>
    %42 = vector.broadcast %40 : vector<8x1xf32> to vector<8x128xf32>
    %43 = vector.broadcast %41 : vector<1x128xf32> to vector<8x128xf32>
    %44 = arith.mulf %42, %43 : vector<8x128xf32>
    %45 = arith.addf %39, %44 : vector<8x128xf32>
    %46 = vector.extract_strided_slice %14 {offsets = [0, 5], sizes = [8, 1], strides = [1, 1]} : vector<8x8xf32> to vector<8x1xf32>
    %47 = vector.extract_strided_slice %4 {offsets = [1, 0], sizes = [1, 128], strides = [1, 1]} : vector<4x128xf32> to vector<1x128xf32>
    %48 = vector.broadcast %46 : vector<8x1xf32> to vector<8x128xf32>
    %49 = vector.broadcast %47 : vector<1x128xf32> to vector<8x128xf32>
    %50 = arith.mulf %48, %49 : vector<8x128xf32>
    %51 = arith.addf %45, %50 : vector<8x128xf32>
    %52 = vector.extract_strided_slice %14 {offsets = [0, 6], sizes = [8, 1], strides = [1, 1]} : vector<8x8xf32> to vector<8x1xf32>
    %53 = vector.extract_strided_slice %4 {offsets = [2, 0], sizes = [1, 128], strides = [1, 1]} : vector<4x128xf32> to vector<1x128xf32>
    %54 = vector.broadcast %52 : vector<8x1xf32> to vector<8x128xf32>
    %55 = vector.broadcast %53 : vector<1x128xf32> to vector<8x128xf32>
    %56 = arith.mulf %54, %55 : vector<8x128xf32>
    %57 = arith.addf %51, %56 : vector<8x128xf32>
    %58 = vector.extract_strided_slice %14 {offsets = [0, 7], sizes = [8, 1], strides = [1, 1]} : vector<8x8xf32> to vector<8x1xf32>
    %59 = vector.extract_strided_slice %4 {offsets = [3, 0], sizes = [1, 128], strides = [1, 1]} : vector<4x128xf32> to vector<1x128xf32>
    %60 = vector.broadcast %58 : vector<8x1xf32> to vector<8x128xf32>
    %61 = vector.broadcast %59 : vector<1x128xf32> to vector<8x128xf32>
    %62 = arith.mulf %60, %61 : vector<8x128xf32>
    %63 = arith.addf %57, %62 : vector<8x128xf32>
    %c0_8 = arith.constant 0 : index
    %c0_9 = arith.constant 0 : index
    %c0_10 = arith.constant 0 : index
    %64 = vector.load %arg4[%c0_8, %c0_9, %c0_10] : memref<1x8x128xf32, #tpu.memory_space<vmem>>, vector<1x8x128xf32>
    %65 = vector.shape_cast %64 : vector<1x8x128xf32> to vector<8x128xf32>
    %66 = vector.shape_cast %63 : vector<8x128xf32> to vector<1x8x128xf32>
    tpu.vector_store %arg4[%c0_8, %c0_9, %c0_10], %66 {strides = array<i32>} : memref<1x8x128xf32, #tpu.memory_space<vmem>>, vector<1x8x128xf32>,
    %c0_11 = arith.constant 0 : index
    %c0_12 = arith.constant 0 : index
    %67 = vector.load %arg5[%c0_11, %c0_12] : memref<4x1xf32, #tpu.memory_space<vmem>>, vector<4x1xf32>
    tpu.vector_store %arg5[%c0_11, %c0_12], %6 {strides = array<i32>} : memref<4x1xf32, #tpu.memory_space<vmem>>, vector<4x1xf32>,
    return
  }
  func.func @transform_0(%arg0: i32, %arg1: i32) -> (i32, i32, i32) {
    %c0_i32 = arith.constant 0 : i32
    %c0_i32_0 = arith.constant 0 : i32
    return %arg0, %c0_i32, %arg1 : i32, i32, i32
  }
  func.func @transform_1(%arg0: i32, %arg1: i32) -> (i32, i32) {
    %c0_i32 = arith.constant 0 : i32
    %c0_i32_0 = arith.constant 0 : i32
    %c0_i32_1 = arith.constant 0 : i32
    return %c0_i32, %c0_i32_0 : i32, i32
  }
  func.func @transform_2(%arg0: i32, %arg1: i32) -> (i32, i32, i32) {
    %c0_i32 = arith.constant 0 : i32
    %c0_i32_0 = arith.constant 0 : i32
    return %arg0, %c0_i32, %arg1 : i32, i32, i32
  }
}

</mosaic_0001>

<bundles_post_ra>
// kernel: tpu_custom_call.1
= control target key start
LH: loop header
LB: loop body
LE: loop exit
PB: predicated region body
PF: predicated region fallthrough
CT: control target
= control target key end

     0   :  { %7 = vsyncpa [#allocation4], 0  ;;  %s901_s0 = inlined_call_operand.hbm [shape: f32[2,4,128], index: 0, kind: input, shape index: {}]   ;;  %s902_s1 = inlined_call_operand.hbm [shape: f32[8,8], index: 1, kind: input, shape index: {}]   ;;  %s903_s2 = inlined_call_operand.hbm [shape: f32[2,8,128], index: 2, kind: output, shape index: {}]  }
   0x1   :  { %9 = vsyncpa [#allocation4 + $0x1], 0 }
   0x2   :  { %10 = vsyncpa [#allocation7], 0 }
   0x3   :  { %11 = vsyncpa [#allocation5], 0 }
   0x4   :  { %13 = vsyncpa [#allocation5 + $0x1], 0  ;;  %s682_s9 = smov 0   ;;  %s684_s10 = smov 0  }
   0x5   :  { %s686_s11 = smov 0   ;;  %s688_s12 = smov 0  }
   0x6   :  { %s690_s13 = smov 0   ;;  %s692_s14 = smov 0  }
   0x7 LB: > { %s402_s15 = sadd.s32 4294967295, %s652_s14   ;;  %s403_s16 = sadd.s32 4294967294, %s652_s14   ;;  %s652_s14 = sphi %s692_s14, %s19_s14   ;;  %s648_s13 = sphi %s690_s13, %s928_s13   ;;  %s644_s12 = sphi %s688_s12, %s927_s12   ;;  %s640_s11 = sphi %s686_s11, %s926_s11   ;;  %s636_s10 = sphi %s684_s10, %s925_s10   ;;  %s632_s9 = sphi %s682_s9, %s924_s9  }
   0x8   : > { %p53_p0 = scmp.ne.s32.totalorder %s636_s10, %s632_s9  ;;  %p716_p1 = scmp.eq.s32.totalorder %s402_s15, 0 }
   0x9   : > { %p720_p2 = scmp.eq.s32.totalorder %s402_s15, 1  ;;  %p106_p3 = scmp.eq.s32.totalorder %s403_s16, 1 }
   0xa   : > { %s908_s17 = scalar_select %p716_p1, 1, 0 }
   0xb   : > { %s909_s18 = scalar_select %p720_p2, 1, 0 }
   0xc   : > { %p726_p4 = por %p716_p1, %p53_p0  ;;  %p404_p5 = scmp.ge.s32.totalorder %s652_s14, 1 }
   0xd   : > { %p731_p6 = por %p106_p3, %p53_p0  ;;  %p113_p7 = scmp.lt.s32.totalorder %s652_s14, 3 }
   0xe   : > { %s910_s19 = scalar_select %p726_p4, 1, 0 }
   0xf   : > { %s911_s20 = scalar_select %p731_p6, 1, 0 }
  0x10   : > { %p736_p8 = pnand %p404_p5, %p113_p7  ;;  %s654_s22 = smov [#allocation6]  }
  0x11   : > { %s126_s23 = sshll.u32 %s654_s22, 4  ;;  %s31_s25 = sadd.s32 1, %s648_s13  ;;  %s127_s23 = int_to_ptr.vmem [resolvable:$true] %s126_s23 }
  0x12   : > { %s912_s21 = scalar_select %p736_p8, 1, 0 }
  0x13   : > { %p425_p10 = pneg %p736_p8  ;;  %s40_s26 = sadd.s32 1, %s640_s11 }
  0x14   : > { %p751_p12 = scmp.ge.s32.totalorder %s31_s25, 2  ;;  %s508_s30 = scalar_lea.hbm %s902_s1, 128 }
  0x15   : > { %p745_p11 = pnand %p425_p10, %p716_p1  ;;  %p509_p13 = scmp.ne.s32.totalorder %s902_s1, %s508_s30 }
  0x16   : > { %s914_s27 = scalar_select %p751_p12, 1, 0 }
  0x17   : > { %p510_p0 = pneg %p745_p11  ;;  %p515_p7 = scmp.lt.u32.totalorder %s508_s30, %s902_s1 }
  0x19   : > { %p511_p3 = pnand %p510_p0, %p509_p13 }
  0x1b   : > { %p512_p5 = pneg %p511_p3 }
  0x1d   : > { %p517_p10 = pnand %p515_p7, %p512_p5 }
  0x1f   : > { %520 = shalt.err (!%p517_p10)
}
  0x20   : > { %s521_s7 = scalar_lea.vmem %s127_s23, 128  ;;  %p529_p4 = scmp.lt.s32.totalorder %s127_s23, %s127_s23 }
  0x21   : > { %p522_p9 = scmp.ne.s32.totalorder %s127_s23, %s521_s7  ;;  %p530_p8 = scmp.lt.s32.totalorder %s521_s7, %s521_s7 }
  0x23   : > { %p524_p6 = pnand %p522_p9, %p510_p0  ;;  %p531_p2 = por %p530_p8, %p529_p4 }
  0x25   : > { %p525_p1 = pneg %p524_p6 }
  0x27   : > { %p532_p12 = pnand %p531_p2, %p525_p1 }
  0x29   : > { %535 = shalt.err (!%p532_p12)
}
  0x2a   : > { %428 = dma.hbm_to_vmem [thread:$0]  (!%p745_p11), %s902_s1, 128, %s127_s23, [#allocation7]  }
  0x2b   : > { %p915_p4 = scmp.ne.s32.totalorder %s914_s27, 0  ;;  %p47_p1 = scmp.ne.s32.totalorder %s640_s11, %s636_s10 }
  0x2c   : > { %p48_p2 = scmp.eq.s32.totalorder %s652_s14, 0  ;;  %p438_p6 = scmp.lt.s32.totalorder %s652_s14, 2 }
  0x2d   : > { %s930_s25 = smov (%p915_p4, %s31_s25), 0  ;;  %p916_p12 = scmp.ne.s32.totalorder %s909_s18, 0 }
  0x2e   : > { %s35_s16 = ssub.s32 %s648_s13, %s930_s25  ;;  %p49_p9 = por %p48_p2, %p47_p1 }
  0x2f   : > { %p38_p8 = scmp.eq.s32.totalorder %s35_s16, 0  ;;  %p783_p13 = por %p916_p12, %p47_p1 }
  0x30   : > { %s137_s24 = sand.u32 1, %s640_s11   ;;  %s408_s27 = sshll.u32 %s648_s13, 6 }
  0x31   : > { %s791_s28 = scalar_select %p38_p8, %s640_s11, %s40_s26  }
  0x32   : > { %s407_s23 = sshll.u32 %s137_s24, 2  ;;  %s797_s3 = scalar_lea.hbm %s901_s0, %s408_s27 }
  0x33   : > { %s141_s18 = scalar_lea.vmem [#allocation3], %s407_s23  ;;  %p801_p11 = pnand %p438_p6, %p49_p9 }
  0x34   : > { %s149_s4 = sshll.u32 %s141_s18, 4  ;;  %s138_s26 = scalar_lea.sflag [#allocation4], %s137_s24  ;;  %s799_s4 = int_to_ptr.vmem [resolvable:$true] %s149_s4 }
  0x35   : > { %s536_s6 = scalar_lea.hbm %s797_s3, 64  ;;  %p538_p3 = pneg %p801_p11 }
  0x36   : > { %p537_p0 = scmp.ne.s32.totalorder %s797_s3, %s536_s6  ;;  %s541_s15 = scalar_lea.hbm %s901_s0, 128 }
  0x37   : > { %p542_p10 = scmp.lt.u32.totalorder %s797_s3, %s901_s0  ;;  %p543_p4 = scmp.lt.u32.totalorder %s541_s15, %s536_s6 }
  0x38   : > { %p539_p5 = pnand %p538_p3, %p537_p0  ;;  %p545_p2 = scmp.lt.u32.totalorder %s536_s6, %s797_s3 }
  0x39   : > { %p544_p1 = por %p543_p4, %p542_p10 }
  0x3a   : > { %p540_p7 = pneg %p539_p5 }
  0x3b   : > { %p546_p6 = por %p545_p2, %p544_p1 }
  0x3d   : > { %p547_p8 = pnand %p546_p6, %p540_p7 }
  0x3f   : > { %550 = shalt.err (!%p547_p8)
}
  0x40   : > { %s551_s24 = scalar_lea.vmem %s799_s4, 64  ;;  %s655_s27 = smov [#allocation3]  }
  0x41   : > { %p552_p9 = scmp.ne.s32.totalorder %s799_s4, %s551_s24  ;;  %s556_s29 = sshll.u32 %s655_s27, 4  ;;  %s557_s29 = int_to_ptr.vmem [resolvable:$false] %s556_s29 }
  0x42   : > { %s558_s30 = scalar_lea.vmem %s557_s29, 128  ;;  %p559_p5 = scmp.lt.s32.totalorder %s799_s4, %s557_s29 }
  0x43   : > { %p554_p12 = pnand %p552_p9, %p538_p3  ;;  %p560_p10 = scmp.lt.s32.totalorder %s558_s30, %s551_s24 }
  0x45   : > { %p555_p0 = pneg %p554_p12  ;;  %p561_p4 = por %p560_p10, %p559_p5 }
  0x47   : > { %p562_p1 = pnand %p561_p4, %p555_p0 }
  0x49   : > { %565 = shalt.err (!%p562_p1)
}
  0x4a   : > { %432 = dma.hbm_to_vmem [thread:$0]  (!%p801_p11), %s797_s3, 64, %s799_s4, %s138_s26  }
  0x4b   : > { %p919_p7 = scmp.ne.s32.totalorder %s912_s21, 0 }
  0x4c   : > { %s833_s18 = sand.u32 (!%p919_p7), 1, %s636_s10   ;;  %p920_p3 = scmp.ne.s32.totalorder (!%p919_p7), %s910_s19, 0 }
  0x4d   : > { %158 = sbr.rel (%p919_p7) target bundleno = 259 (0x103), region = 28  ;;  %s410_s6 = sshll.u32 (!%p919_p7), %s833_s18, 2 }
  0x4e   : > { %s161_s7 = scalar_lea.sflag (!%p919_p7), [#allocation4], %s833_s18  ;;  %s164_s8 = scalar_lea.vmem (!%p919_p7), [#allocation3], %s410_s6 }
  0x54   : > { %619 = dma.done.wait (%p920_p3), %s161_s7, 64  }
  0x55   : > { %621 = vsyncadd (%p920_p3), %s161_s7, 4294967232  ;;  %p921_p2 = scmp.ne.s32.totalorder %s908_s17, 0 }
  0x57   : > { %623 = dma.done.wait (%p921_p2), [#allocation7], 128  }
  0x58   : > { %625 = vsyncadd (%p921_p2), [#allocation7], 4294967168  ;;  %vm193_vm0 = vcmask 3072   ;;  %v656_v0 = vmov 0.0   ;;  %v657_v1 = vmov 0   ;;  %v658_v2 = vmov 1  }
  0x59   : > { %194 = vst.msk [vmem:[#allocation2] sm:$0xf] %vm193_vm0, %v656_v0  ;;  %500 = vset.pattern.permute.xlu0 %v657_v1  ;;  %501 = vset.pattern.permute.xlu1 %v658_v2  ;;  %v208_v3 = vld [vmem:[#allocation6] sm:$0xff]  ;;  %v195_v4 = vld [vmem:[%s164_s8] sm:$0xf]  ;;  %s659_s19 = smov 1   ;;  %v199_v12 = vlaneseq }
  0x5a   : > { %211 = vperm.xlu0 %500, %v208_v3   ;;  %221 = vperm.xlu1 %501, %v208_v3   ;;  %v660_v5 = vmov 2   ;;  %v661_v7 = vmov 3   ;;  %v662_v8 = vmov 4   ;;  %v663_v9 = vmov 5   ;;  %s412_s17 = sshll.u32 %s833_s18, 3  ;;  %s414_s21 = sshll.u32 %s644_s12, 7 }
  0x5b   : > { %v664_v10 = vmov 7   ;;  %v665_v11 = vmov 6   ;;  %v200_v15 = vand.u32 127, %v199_v12  ;;  %v215_v16 = vshrl.u32 %v199_v12, 7  ;;  %s188_s3 = scalar_lea.vmem [#allocation8], %s412_s17  ;;  %s852_s15 = scalar_lea.hbm %s903_s2, %s414_s21 }
  0x5c   : > { %s312_s4 = sshll.u32 %s188_s3, 4  ;;  %s298_s16 = scalar_lea.sflag [#allocation5], %s833_s18  ;;  %s854_s4 = int_to_ptr.vmem [resolvable:$true] %s312_s4 }
  0x5d   : > { %vm201_vm1 = vcmp.eq.s32.totalorder %v200_v15, 0  ;;  %v216_v19 = vsub.s32 0, %v215_v16  ;;  %v226_v20 = vsub.s32 1, %v215_v16  ;;  %v236_v21 = vsub.s32 2, %v215_v16  ;;  %s566_s12 = scalar_lea.vmem %s854_s4, 128  ;;  %s666_s23 = smov [#allocation8]  }
  0x5e   : > { %197 = vrot.lane.b32.xlu0 %v195_v4, %s659_s19  ;;  %502 = vset.pattern.permute.xlu1 %v660_v5  ;;  %v246_v23 = vsub.s32 3, %v215_v16  ;;  %p567_p11 = scmp.ne.s32.totalorder %s854_s4, %s566_s12  ;;  %s570_s24 = sshll.u32 %s666_s23, 4  ;;  %s571_s24 = int_to_ptr.vmem [resolvable:$false] %s570_s24 }
  0x5f   : > { %231 = vperm.xlu1 %502, %v208_v3   ;;  %v257_v32 = vrot.slane %v195_v4, %v216_v19  ;;  %v267_v39 = vrot.slane %v195_v4, %v226_v20  ;;  %v277_v41 = vrot.slane %v195_v4, %v236_v21  ;;  %s572_s27 = scalar_lea.vmem %s571_s24, 256  ;;  %p573_p9 = scmp.lt.s32.totalorder %s854_s4, %s571_s24 }
  0x60   : > { %v196_v6 = vld [vmem:[#allocation2] sm:$0xf]  ;;  %v287_v43 = vrot.slane %v195_v4, %v246_v23  ;;  %p568_p6 = pnand %p567_p11, %p783_p13  ;;  %p574_p12 = scmp.lt.s32.totalorder %s572_s27, %s566_s12 }
  0x62   : > { %204 = vperm.xlu0 %500, %v196_v6   ;;  %p569_p8 = pneg %p568_p6  ;;  %p575_p0 = por %p574_p12, %p573_p9 }
  0x63   : > { %503 = vset.pattern.permute.xlu1 %v661_v7 }
  0x64   : > { %241 = vperm.xlu1 %503, %v208_v3   ;;  %p576_p5 = pnand %p575_p0, %p569_p8 }
  0x66   : > { %504 = vset.pattern.permute.xlu0 %v662_v8 }
  0x67   : > { %251 = vperm.xlu0 %504, %v208_v3  }
  0x68   : > { %505 = vset.pattern.permute.xlu1 %v663_v9 }
  0x69   : > { %261 = vperm.xlu1 %505, %v208_v3  }
  0x6b   : > { %507 = vset.pattern.permute.xlu0 %v664_v10 }
  0x6c   : > { %281 = vperm.xlu0 %507, %v208_v3  }
  0x6d   : > { %506 = vset.pattern.permute.xlu1 %v665_v11 }
  0x6e   : > { %271 = vperm.xlu1 %506, %v208_v3  }
  0x72   : > { %292 = vrot.lane.b32.xlu1 %v195_v4, %s659_s19 }
  0xd9   : > { %v212_v13 = vpop.permute.xlu0 %211  ;;  %v222_v14 = vpop.permute.xlu1 %221 }
  0xdd   : > { %v198_v17 = vpop.permute.xlu0 %197 }
  0xde   : > { %v232_v18 = vpop.permute.xlu1 %231 }
  0xe1   : > { %v205_v22 = vpop.permute.xlu0 %204 }
  0xe2   : > { %v207_v24 = vsel %vm201_vm1, %v205_v22, %v198_v17 }
  0xe3   : > { %v242_v25 = vpop.permute.xlu1 %241  ;;  %v217_v26 = vrot.slane %v207_v24, %v216_v19  ;;  %v227_v27 = vrot.slane %v207_v24, %v226_v20  ;;  %v237_v28 = vrot.slane %v207_v24, %v236_v21  ;;  %v247_v31 = vrot.slane %v207_v24, %v246_v23 }
  0xe5   : > { %v218_v29 = vmul.f32 %v217_v26, %v212_v13  ;;  %v228_v30 = vmul.f32 %v227_v27, %v222_v14  ;;  %v238_v35 = vmul.f32 %v237_v28, %v232_v18  ;;  %v248_v38 = vmul.f32 %v247_v31, %v242_v25 }
  0xe6   : > { %v252_v33 = vpop.permute.xlu0 %251 }
  0xe7   : > { %v229_v34 = vadd.f32 %v228_v30, %v218_v29  ;;  %v258_v40 = vmul.f32 %v257_v32, %v252_v33 }
  0xe8   : > { %v262_v36 = vpop.permute.xlu1 %261 }
  0xe9   : > { %v239_v37 = vadd.f32 %v238_v35, %v229_v34  ;;  %v268_v45 = vmul.f32 %v267_v39, %v262_v36 }
  0xeb   : > { %v249_v42 = vadd.f32 %v248_v38, %v239_v37  ;;  %v282_v44 = vpop.permute.xlu0 %281 }
  0xec   : > { %v288_v50 = vmul.f32 %v287_v43, %v282_v44 }
  0xed   : > { %v259_v46 = vadd.f32 %v258_v40, %v249_v42  ;;  %v272_v47 = vpop.permute.xlu1 %271 }
  0xee   : > { %v278_v48 = vmul.f32 %v277_v41, %v272_v47 }
  0xef   : > { %v269_v49 = vadd.f32 %v268_v45, %v259_v46 }
  0xf1   : > { %v279_v51 = vadd.f32 %v278_v48, %v269_v49  ;;  %v293_v52 = vpop.permute.xlu1 %292 }
  0xf2   : > { %296 = vst.msk [vmem:[#allocation2] sm:$0xf] %vm193_vm0, %v293_v52 }
  0xf3   : > { %v289_v53 = vadd.f32 %v288_v50, %v279_v51 }
  0xf5   : > { %290 = vst [vmem:[%s188_s3] sm:$0xff] %v289_v53 }
  0xf6   : > { %579 = shalt.err (!%p576_p5)
}
  0xf7   : > { %s580_s29 = scalar_lea.hbm %s852_s15, 128  ;;  %s584_s6 = scalar_lea.hbm %s903_s2, 256 }
  0xf8   : > { %p581_p10 = scmp.ne.s32.totalorder %s852_s15, %s580_s29  ;;  %p585_p7 = scmp.lt.u32.totalorder %s852_s15, %s903_s2 }
  0xf9   : > { %p586_p3 = scmp.lt.u32.totalorder %s584_s6, %s580_s29  ;;  %p588_p11 = scmp.lt.u32.totalorder %s580_s29, %s852_s15 }
  0xfa   : > { %p582_p4 = pnand %p581_p10, %p783_p13 }
  0xfb   : > { %p587_p2 = por %p586_p3, %p585_p7 }
  0xfc   : > { %p583_p1 = pneg %p582_p4 }
  0xfd   : > { %p589_p6 = por %p588_p11, %p587_p2 }
  0xff   : > { %p590_p8 = pnand %p589_p6, %p583_p1 }
 0x101   : > { %593 = shalt.err (!%p590_p8)
}
 0x102   : > { %423 = dma.vmem_to_hbm [thread:$0]  (%p783_p13), %s854_s4, 128, %s852_s15, %s298_s16  }
 0x103 PF: > { %s324_s19 = sand.u32 1, %s632_s9   ;;  %p922_p9 = scmp.ne.s32.totalorder %s911_s20, 0 }
 0x104   : > { %p923_p12 = scmp.ge.s32.totalorder %s652_s14, 2  ;;  %s325_s17 = scalar_lea.sflag [#allocation5], %s324_s19 }
 0x106   : > { %p434_p0 = pnand %p923_p12, %p922_p9 }
 0x108   : > { %627 = dma.done.wait (!%p434_p0), %s325_s17, 128  }
 0x109   : > { %629 = vsyncadd (!%p434_p0), %s325_s17, 4294967168  ;;  %s19_s14 = sadd.s32 1, %s652_s14   ;;  %s924_s9 = smov %s636_s10 }
 0x10a   : > { %p16_p5 = scmp.ge.s32.totalorder %s19_s14, 4   ;;  %s925_s10 = smov %s640_s11 }
 0x10b   : > { %s926_s11 = smov %s791_s28  ;;  %s927_s12 = smov %s648_s13 }
 0x10c   : > { %s928_s13 = smov %s930_s25  ;;  %18 = sbr.rel (!%p16_p5) target bundleno = 7 (0x7), region = 81 }
 0x113   :  { %330 = vsyncpa [#allocation4], 1 }
 0x114   :  { %332 = vsyncpa [#allocation4 + $0x1], 1 }
 0x115   :  { %333 = vsyncpa [#allocation7], 1 }
 0x116   :  { %334 = vsyncpa [#allocation5], 1 }
 0x117   :  { %336 = vsyncpa [#allocation5 + $0x1], 1 }

</bundles_post_ra>
